<compile_context>
chip_gen: v6e
topology: v6e:2x2x1
jax: 0.10.0
libtpu: 0.0.40
codegen_flags: <defaults>
</compile_context>

<pallas_src>
import functools

import jax
import jax.numpy as jnp
from jax.experimental import pallas as pl
from jax.experimental.pallas import tpu as pltpu

# ---- model configuration (small, consistent with the module) -----------------
SEQ = 8            # seq_len
BATCH = 2          # batch
EMBED = 32         # embed_dim
HEADS = 4          # num_heads
HEAD_DIM = EMBED // HEADS
NEG_INF = -1e30    # finite "minus infinity" for the additive mask
LANES = 128        # lane width for lane-dense weight/output slabs


def attention_kernel(x_ref, mask_ref, w_ref, b_ref, o_ref, *, E, H, D):
    """x_ref:    (B*S, E)     bf16  batch-fused activations
    mask_ref: (B*S, B*S)   f32   additive mask (block-diag over batch, 0/-1e30)
    w_ref:    (2, E, 128)  bf16  [0]=[wq*scale|wk|wv|0pad], [1]=[wo|0pad]
    b_ref:    (2, 128)     f32   [0]=[bq*scale|bk|bv|0pad], [1]=[bo|0pad]
    o_ref:    (B*S, 128)   f32   valid data in lanes [0, E), zeros elsewhere."""
    x = x_ref[...]                                       # (16, 32) bf16
    w_qkv = w_ref[0]                                     # (32, 128) bf16
    w_out = w_ref[1]                                     # (32, 128) bf16
    b_qkv = b_ref[0:1, :]                                # (1, 128) f32
    b_out = b_ref[1:2, :]                                # (1, 128) f32
    add_mask = mask_ref[...]                             # (16, 16) f32

    # One fused QKV projection for BOTH batch slabs (single MXU push).
    qkv = jnp.dot(x, w_qkv, preferred_element_type=jnp.float32) + b_qkv  # (16,128)

    # Per-head attention on the batch-fused (block-diagonal) score matrix.
    heads = []
    for h in range(H):                                   # static, H = 4
        qh = qkv[:, h * D:(h + 1) * D].astype(jnp.bfloat16)                 # (16, 8)
        kh = qkv[:, E + h * D:E + (h + 1) * D].astype(jnp.bfloat16)         # (16, 8)
        vh = qkv[:, 2 * E + h * D:2 * E + (h + 1) * D].astype(jnp.bfloat16) # (16, 8)
        s = jnp.einsum("qd,kd->qk", qh, kh,
                       preferred_element_type=jnp.float32) + add_mask       # (16,16)
        # Explicit softmax: exp on the EUP, approx reciprocal on the EUP slot.
        m = jnp.max(s, axis=-1, keepdims=True)
        e = jnp.exp(s - m)
        p = e * pl.reciprocal(jnp.sum(e, axis=-1, keepdims=True), approx=True)
        heads.append(jnp.dot(p.astype(jnp.bfloat16), vh,
                             preferred_element_type=jnp.float32))            # (16, 8)

    # Concatenate heads along lanes (XLU, free slot) and do ONE fused output
    # projection; w_out lanes >= E are zero, so the (16, 128) result is
    # lane-dense and writes back with a single unmasked store.
    o_heads = jnp.concatenate(heads, axis=-1).astype(jnp.bfloat16)           # (16, 32)
    o_ref[...] = jnp.dot(o_heads, w_out,
                         preferred_element_type=jnp.float32) + b_out


def attention_pallas(x_sbe, attn_mask, key_padding_mask, params):
    """x_sbe: (S, B, E) f32; attn_mask: (S, S) {0,1}; key_padding_mask: (B, S) {0,1}.
    Returns (S, B, E), matching the PyTorch Attention.forward output."""
    S, B, E = x_sbe.shape
    H, D = HEADS, E // HEADS
    scale = D ** -0.5

    # ---- weight / bias packing (one-time layout plumbing, lane-dense 128) ----
    # scale folded into q weight AND bias (PyTorch scales q after the bias add).
    wq = params["wq"] * scale
    bq = params["bq"] * scale
    w_qkv = jnp.concatenate(
        [wq, params["wk"], params["wv"],
         jnp.zeros((E, LANES - 3 * E), jnp.float32)], axis=1)        # (E, 128)
    w_out = jnp.concatenate(
        [params["wo"], jnp.zeros((E, LANES - E), jnp.float32)], axis=1)
    w_packed = jnp.stack([w_qkv, w_out]).astype(jnp.bfloat16)        # (2, E, 128)

    b_qkv = jnp.concatenate(
        [bq, params["bk"], params["bv"],
         jnp.zeros((1, LANES - 3 * E), jnp.float32)], axis=1)
    b_out = jnp.concatenate(
        [params["bo"], jnp.zeros((1, LANES - E), jnp.float32)], axis=1)
    b_packed = jnp.concatenate([b_qkv, b_out], axis=0)               # (2, 128) f32

    # ---- batch-fused activations: (S, B, E) -> (B*S, E), bf16 MXU operand ----
    x2d = jnp.transpose(x_sbe, (1, 0, 2)).reshape(B * S, E).astype(jnp.bfloat16)

    # ---- precombined additive mask: block-diagonal (B*S, B*S), 0 / -1e30 ----
    am = attn_mask > 0.5                                             # (S, S)
    kpm = key_padding_mask > 0.5                                     # (B, S)
    per_batch = am[None, :, :] | kpm[:, None, :]                     # (B, S, S)
    masked = jnp.ones((B * S, B * S), dtype=bool)                    # cross-batch masked
    for b in range(B):
        masked = masked.at[b * S:(b + 1) * S, b * S:(b + 1) * S].set(per_batch[b])
    add_mask = jnp.where(masked, NEG_INF, 0.0).astype(jnp.float32)   # (B*S, B*S)

    kernel = functools.partial(attention_kernel, E=E, H=H, D=D)
    vmem_spec = pl.BlockSpec(memory_space=pltpu.MemorySpace.VMEM)
    out2d = pl.pallas_call(
        kernel,
        out_shape=jax.ShapeDtypeStruct((B * S, LANES), jnp.float32),
        in_specs=[vmem_spec, vmem_spec, vmem_spec, vmem_spec],
        out_specs=vmem_spec,
        cost_estimate=pl.CostEstimate(flops=262144, bytes_accessed=28672,
                                      transcendentals=1152),
    )(x2d, add_mask, w_packed, b_packed)

    # slice off the zero-pad lanes and restore (S, B, E)
    return out2d[:, :E].reshape(B, S, E).transpose(1, 0, 2)


# ---- pure-JAX f32 reference (same math as the PyTorch module) -----------------
def attention_ref(x_sbe, attn_mask, key_padding_mask, p):
    S, B, E = x_sbe.shape
    H, D = HEADS, E // HEADS
    q = x_sbe @ p["wq"] + p["bq"]
    k = x_sbe @ p["wk"] + p["bk"]
    v = x_sbe @ p["wv"] + p["bv"]

    def shape(t):                                        # PyTorch _shape
        return t.reshape(S, B * H, D).transpose(1, 0, 2)       # (B*H, S, D)

    q = shape(q) * (D ** -0.5)
    k = shape(k)
    v = shape(v)

    am = attn_mask[None] > 0.5                                        # (1, S, S)
    kpm = key_padding_mask > 0.5                                      # (B, S)
    kpm = jnp.broadcast_to(kpm[:, None, None, :], (B, H, 1, S)).reshape(B * H, 1, S)
    add = jnp.where(am | kpm, NEG_INF, 0.0)                           # (B*H, S, S)

    s = jnp.einsum("nqd,nkd->nqk", q, k) + add
    a = jax.nn.softmax(s, axis=-1)
    o = jnp.einsum("nqk,nkd->nqd", a, v)                              # (B*H, S, D)
    o = o.transpose(1, 0, 2).reshape(S, B, E)
    return o @ p["wo"] + p["bo"]


def make_params(key):
    ks = jax.random.split(key, 4)

    def lin(k, din, dout, boff):
        # weights stored as (in, out) so x @ W + b == PyTorch x W^T + b
        w = jax.random.normal(k, (din, dout), jnp.float32) * (din ** -0.5)
        b = jnp.full((1, dout), boff, jnp.float32)
        return w, b

    wq, bq = lin(ks[0], EMBED, EMBED, 0.01)
    wk, bk = lin(ks[1], EMBED, EMBED, 0.02)
    wv, bv = lin(ks[2], EMBED, EMBED, 0.03)
    wo, bo = lin(ks[3], EMBED, EMBED, 0.04)
    return dict(wq=wq, bq=bq, wk=wk, bk=bk, wv=wv, bv=bv, wo=wo, bo=bo)


if __name__ == "__main__":
    key = jax.random.PRNGKey(0)
    kx, kp = jax.random.split(key)
    x = jax.random.normal(kx, (SEQ, BATCH, EMBED), jnp.float32)   # (seq, batch, embed)
    params = make_params(kp)

    # attn_mask: (S, S), 1 = masked out (causal-style, every row keeps some keys)
    attn_mask = jnp.triu(jnp.ones((SEQ, SEQ), jnp.float32), k=1)
    # key_padding_mask: (B, S), 1 = padding (last two keys of batch 1 are padding)
    key_padding_mask = jnp.zeros((BATCH, SEQ), jnp.float32).at[1, -2:].set(1.0)

    out = attention_pallas(x, attn_mask, key_padding_mask, params)
    out = jax.block_until_ready(out)

    ref = attention_ref(x, attn_mask, key_padding_mask, params)
    assert out.shape == (SEQ, BATCH, EMBED)
    # bf16 MXU operands + approx reciprocal in the kernel vs an f32 reference
    # => relaxed tolerance (observed error is well inside this bound).
    assert jnp.allclose(out, ref, atol=2e-2, rtol=2e-2), "mismatch vs reference"
    print("KERNEL_OK")
</pallas_src>

<mosaic_0001>
module attributes {stable_mosaic.version = 11 : i64} {
  func.func @attention_kernel(%arg0: memref<16x32xbf16, #tpu.memory_space<vmem>>, %arg1: memref<16x16xf32, #tpu.memory_space<vmem>>, %arg2: memref<2x32x128xbf16, #tpu.memory_space<vmem>>, %arg3: memref<2x128xf32, #tpu.memory_space<vmem>>, %arg4: memref<16x128xf32, #tpu.memory_space<vmem>>) attributes {dimension_semantics = [], scalar_prefetch = 0 : i64, scratch_operands = 0 : i64, tpu.core_type = #tpu.core_type<tc>} {
    %c0 = arith.constant 0 : index
    %c0_0 = arith.constant 0 : index
    %0 = vector.load %arg0[%c0, %c0_0] : memref<16x32xbf16, #tpu.memory_space<vmem>>, vector<16x32xbf16>
    %c0_1 = arith.constant 0 : index
    %c0_2 = arith.constant 0 : index
    %c0_3 = arith.constant 0 : index
    %1 = vector.load %arg2[%c0_1, %c0_2, %c0_3] : memref<2x32x128xbf16, #tpu.memory_space<vmem>>, vector<1x32x128xbf16>
    %2 = vector.shape_cast %1 : vector<1x32x128xbf16> to vector<32x128xbf16>
    %c1 = arith.constant 1 : index
    %c0_4 = arith.constant 0 : index
    %c0_5 = arith.constant 0 : index
    %3 = vector.load %arg2[%c1, %c0_4, %c0_5] : memref<2x32x128xbf16, #tpu.memory_space<vmem>>, vector<1x32x128xbf16>
    %4 = vector.shape_cast %3 : vector<1x32x128xbf16> to vector<32x128xbf16>
    %c0_6 = arith.constant 0 : index
    %c0_7 = arith.constant 0 : index
    %5 = vector.load %arg3[%c0_6, %c0_7] : memref<2x128xf32, #tpu.memory_space<vmem>>, vector<1x128xf32>
    %c1_8 = arith.constant 1 : index
    %c0_9 = arith.constant 0 : index
    %6 = vector.load %arg3[%c1_8, %c0_9] : memref<2x128xf32, #tpu.memory_space<vmem>>, vector<1x128xf32>
    %c0_10 = arith.constant 0 : index
    %c0_11 = arith.constant 0 : index
    %7 = vector.load %arg1[%c0_10, %c0_11] : memref<16x16xf32, #tpu.memory_space<vmem>>, vector<16x16xf32>
    %cst = arith.constant dense<0.000000e+00> : vector<16x128xf32>
    %8 = tpu.matmul %0, %2, %cst {dimension_numbers = #tpu.dot_dimension_numbers<[1], [0], [0], [1], [0, 0, 1, 1], [], []>} : vector<16x32xbf16>, vector<32x128xbf16>, vector<16x128xf32> -> vector<16x128xf32>
    %9 = vector.broadcast %5 : vector<1x128xf32> to vector<16x128xf32>
    %10 = arith.addf %8, %9 : vector<16x128xf32>
    %11 = vector.extract_strided_slice %10 {offsets = [0, 0], sizes = [16, 8], strides = [1, 1]} : vector<16x128xf32> to vector<16x8xf32>
    %12 = arith.truncf %11 : vector<16x8xf32> to vector<16x8xbf16>
    %13 = vector.extract_strided_slice %10 {offsets = [0, 32], sizes = [16, 8], strides = [1, 1]} : vector<16x128xf32> to vector<16x8xf32>
    %14 = arith.truncf %13 : vector<16x8xf32> to vector<16x8xbf16>
    %15 = vector.extract_strided_slice %10 {offsets = [0, 64], sizes = [16, 8], strides = [1, 1]} : vector<16x128xf32> to vector<16x8xf32>
    %16 = arith.truncf %15 : vector<16x8xf32> to vector<16x8xbf16>
    "tpu.trace_start"() <{level = 10 : i32, message = "qd,kd->qk"}> : () -> ()
    %cst_12 = arith.constant dense<0.000000e+00> : vector<16x16xf32>
    %17 = tpu.matmul %12, %14, %cst_12 {dimension_numbers = #tpu.dot_dimension_numbers<[1], [1], [0], [0], [0, 0, 1, 0], [], []>} : vector<16x8xbf16>, vector<16x8xbf16>, vector<16x16xf32> -> vector<16x16xf32>
    "tpu.trace_stop"() : () -> ()
    %18 = arith.addf %17, %7 : vector<16x16xf32>
    %cst_13 = arith.constant dense<0xFF800000> : vector<16xf32>
    %19 = vector.multi_reduction <maximumf>, %18, %cst_13 [1] : vector<16x16xf32> to vector<16xf32>
    %20 = vector.shape_cast %19 : vector<16xf32> to vector<16x1xf32>
    %21 = vector.broadcast %20 : vector<16x1xf32> to vector<16x16xf32>
    %22 = arith.subf %18, %21 : vector<16x16xf32>
    %23 = math.exp %22 : vector<16x16xf32>
    %cst_14 = arith.constant dense<0.000000e+00> : vector<16xf32>
    %24 = vector.multi_reduction <add>, %23, %cst_14 [1] : vector<16x16xf32> to vector<16xf32>
    %25 = vector.shape_cast %24 : vector<16xf32> to vector<16x1xf32>
    %26 = tpu.reciprocal %25 {approx = true} : vector<16x1xf32> -> vector<16x1xf32>
    %27 = vector.broadcast %26 : vector<16x1xf32> to vector<16x16xf32>
    %28 = arith.mulf %23, %27 : vector<16x16xf32>
    %29 = arith.truncf %28 : vector<16x16xf32> to vector<16x16xbf16>
    %cst_15 = arith.constant dense<0.000000e+00> : vector<16x8xf32>
    %30 = tpu.matmul %29, %16, %cst_15 {dimension_numbers = #tpu.dot_dimension_numbers<[1], [0], [0], [1], [0, 0, 1, 1], [], []>} : vector<16x16xbf16>, vector<16x8xbf16>, vector<16x8xf32> -> vector<16x8xf32>
    %31 = vector.extract_strided_slice %10 {offsets = [0, 8], sizes = [16, 8], strides = [1, 1]} : vector<16x128xf32> to vector<16x8xf32>
    %32 = arith.truncf %31 : vector<16x8xf32> to vector<16x8xbf16>
    %33 = vector.extract_strided_slice %10 {offsets = [0, 40], sizes = [16, 8], strides = [1, 1]} : vector<16x128xf32> to vector<16x8xf32>
    %34 = arith.truncf %33 : vector<16x8xf32> to vector<16x8xbf16>
    %35 = vector.extract_strided_slice %10 {offsets = [0, 72], sizes = [16, 8], strides = [1, 1]} : vector<16x128xf32> to vector<16x8xf32>
    %36 = arith.truncf %35 : vector<16x8xf32> to vector<16x8xbf16>
    "tpu.trace_start"() <{level = 10 : i32, message = "qd,kd->qk"}> : () -> ()
    %cst_16 = arith.constant dense<0.000000e+00> : vector<16x16xf32>
    %37 = tpu.matmul %32, %34, %cst_16 {dimension_numbers = #tpu.dot_dimension_numbers<[1], [1], [0], [0], [0, 0, 1, 0], [], []>} : vector<16x8xbf16>, vector<16x8xbf16>, vector<16x16xf32> -> vector<16x16xf32>
    "tpu.trace_stop"() : () -> ()
    %38 = arith.addf %37, %7 : vector<16x16xf32>
    %cst_17 = arith.constant dense<0xFF800000> : vector<16xf32>
    %39 = vector.multi_reduction <maximumf>, %38, %cst_17 [1] : vector<16x16xf32> to vector<16xf32>
    %40 = vector.shape_cast %39 : vector<16xf32> to vector<16x1xf32>
    %41 = vector.broadcast %40 : vector<16x1xf32> to vector<16x16xf32>
    %42 = arith.subf %38, %41 : vector<16x16xf32>
    %43 = math.exp %42 : vector<16x16xf32>
    %cst_18 = arith.constant dense<0.000000e+00> : vector<16xf32>
    %44 = vector.multi_reduction <add>, %43, %cst_18 [1] : vector<16x16xf32> to vector<16xf32>
    %45 = vector.shape_cast %44 : vector<16xf32> to vector<16x1xf32>
    %46 = tpu.reciprocal %45 {approx = true} : vector<16x1xf32> -> vector<16x1xf32>
    %47 = vector.broadcast %46 : vector<16x1xf32> to vector<16x16xf32>
    %48 = arith.mulf %43, %47 : vector<16x16xf32>
    %49 = arith.truncf %48 : vector<16x16xf32> to vector<16x16xbf16>
    %cst_19 = arith.constant dense<0.000000e+00> : vector<16x8xf32>
    %50 = tpu.matmul %49, %36, %cst_19 {dimension_numbers = #tpu.dot_dimension_numbers<[1], [0], [0], [1], [0, 0, 1, 1], [], []>} : vector<16x16xbf16>, vector<16x8xbf16>, vector<16x8xf32> -> vector<16x8xf32>
    %51 = vector.extract_strided_slice %10 {offsets = [0, 16], sizes = [16, 8], strides = [1, 1]} : vector<16x128xf32> to vector<16x8xf32>
    %52 = arith.truncf %51 : vector<16x8xf32> to vector<16x8xbf16>
    %53 = vector.extract_strided_slice %10 {offsets = [0, 48], sizes = [16, 8], strides = [1, 1]} : vector<16x128xf32> to vector<16x8xf32>
    %54 = arith.truncf %53 : vector<16x8xf32> to vector<16x8xbf16>
    %55 = vector.extract_strided_slice %10 {offsets = [0, 80], sizes = [16, 8], strides = [1, 1]} : vector<16x128xf32> to vector<16x8xf32>
    %56 = arith.truncf %55 : vector<16x8xf32> to vector<16x8xbf16>
    "tpu.trace_start"() <{level = 10 : i32, message = "qd,kd->qk"}> : () -> ()
    %cst_20 = arith.constant dense<0.000000e+00> : vector<16x16xf32>
    %57 = tpu.matmul %52, %54, %cst_20 {dimension_numbers = #tpu.dot_dimension_numbers<[1], [1], [0], [0], [0, 0, 1, 0], [], []>} : vector<16x8xbf16>, vector<16x8xbf16>, vector<16x16xf32> -> vector<16x16xf32>
    "tpu.trace_stop"() : () -> ()
    %58 = arith.addf %57, %7 : vector<16x16xf32>
    %cst_21 = arith.constant dense<0xFF800000> : vector<16xf32>
    %59 = vector.multi_reduction <maximumf>, %58, %cst_21 [1] : vector<16x16xf32> to vector<16xf32>
    %60 = vector.shape_cast %59 : vector<16xf32> to vector<16x1xf32>
    %61 = vector.broadcast %60 : vector<16x1xf32> to vector<16x16xf32>
    %62 = arith.subf %58, %61 : vector<16x16xf32>
    %63 = math.exp %62 : vector<16x16xf32>
    %cst_22 = arith.constant dense<0.000000e+00> : vector<16xf32>
    %64 = vector.multi_reduction <add>, %63, %cst_22 [1] : vector<16x16xf32> to vector<16xf32>
    %65 = vector.shape_cast %64 : vector<16xf32> to vector<16x1xf32>
    %66 = tpu.reciprocal %65 {approx = true} : vector<16x1xf32> -> vector<16x1xf32>
    %67 = vector.broadcast %66 : vector<16x1xf32> to vector<16x16xf32>
    %68 = arith.mulf %63, %67 : vector<16x16xf32>
    %69 = arith.truncf %68 : vector<16x16xf32> to vector<16x16xbf16>
    %cst_23 = arith.constant dense<0.000000e+00> : vector<16x8xf32>
    %70 = tpu.matmul %69, %56, %cst_23 {dimension_numbers = #tpu.dot_dimension_numbers<[1], [0], [0], [1], [0, 0, 1, 1], [], []>} : vector<16x16xbf16>, vector<16x8xbf16>, vector<16x8xf32> -> vector<16x8xf32>
    %71 = vector.extract_strided_slice %10 {offsets = [0, 24], sizes = [16, 8], strides = [1, 1]} : vector<16x128xf32> to vector<16x8xf32>
    %72 = arith.truncf %71 : vector<16x8xf32> to vector<16x8xbf16>
    %73 = vector.extract_strided_slice %10 {offsets = [0, 56], sizes = [16, 8], strides = [1, 1]} : vector<16x128xf32> to vector<16x8xf32>
    %74 = arith.truncf %73 : vector<16x8xf32> to vector<16x8xbf16>
    %75 = vector.extract_strided_slice %10 {offsets = [0, 88], sizes = [16, 8], strides = [1, 1]} : vector<16x128xf32> to vector<16x8xf32>
    %76 = arith.truncf %75 : vector<16x8xf32> to vector<16x8xbf16>
    "tpu.trace_start"() <{level = 10 : i32, message = "qd,kd->qk"}> : () -> ()
    %cst_24 = arith.constant dense<0.000000e+00> : vector<16x16xf32>
    %77 = tpu.matmul %72, %74, %cst_24 {dimension_numbers = #tpu.dot_dimension_numbers<[1], [1], [0], [0], [0, 0, 1, 0], [], []>} : vector<16x8xbf16>, vector<16x8xbf16>, vector<16x16xf32> -> vector<16x16xf32>
    "tpu.trace_stop"() : () -> ()
    %78 = arith.addf %77, %7 : vector<16x16xf32>
    %cst_25 = arith.constant dense<0xFF800000> : vector<16xf32>
    %79 = vector.multi_reduction <maximumf>, %78, %cst_25 [1] : vector<16x16xf32> to vector<16xf32>
    %80 = vector.shape_cast %79 : vector<16xf32> to vector<16x1xf32>
    %81 = vector.broadcast %80 : vector<16x1xf32> to vector<16x16xf32>
    %82 = arith.subf %78, %81 : vector<16x16xf32>
    %83 = math.exp %82 : vector<16x16xf32>
    %cst_26 = arith.constant dense<0.000000e+00> : vector<16xf32>
    %84 = vector.multi_reduction <add>, %83, %cst_26 [1] : vector<16x16xf32> to vector<16xf32>
    %85 = vector.shape_cast %84 : vector<16xf32> to vector<16x1xf32>
    %86 = tpu.reciprocal %85 {approx = true} : vector<16x1xf32> -> vector<16x1xf32>
    %87 = vector.broadcast %86 : vector<16x1xf32> to vector<16x16xf32>
    %88 = arith.mulf %83, %87 : vector<16x16xf32>
    %89 = arith.truncf %88 : vector<16x16xf32> to vector<16x16xbf16>
    %cst_27 = arith.constant dense<0.000000e+00> : vector<16x8xf32>
    %90 = tpu.matmul %89, %76, %cst_27 {dimension_numbers = #tpu.dot_dimension_numbers<[1], [0], [0], [1], [0, 0, 1, 1], [], []>} : vector<16x16xbf16>, vector<16x8xbf16>, vector<16x8xf32> -> vector<16x8xf32>
    %91 = tpu.concatenate %30, %50, %70, %90 in 1 : vector<16x8xf32>, vector<16x8xf32>, vector<16x8xf32>, vector<16x8xf32> -> vector<16x32xf32>
    %92 = arith.truncf %91 : vector<16x32xf32> to vector<16x32xbf16>
    %cst_28 = arith.constant dense<0.000000e+00> : vector<16x128xf32>
    %93 = tpu.matmul %92, %4, %cst_28 {dimension_numbers = #tpu.dot_dimension_numbers<[1], [0], [0], [1], [0, 0, 1, 1], [], []>} : vector<16x32xbf16>, vector<32x128xbf16>, vector<16x128xf32> -> vector<16x128xf32>
    %94 = vector.broadcast %6 : vector<1x128xf32> to vector<16x128xf32>
    %95 = arith.addf %93, %94 : vector<16x128xf32>
    %c0_29 = arith.constant 0 : index
    %c0_30 = arith.constant 0 : index
    %96 = vector.load %arg4[%c0_29, %c0_30] : memref<16x128xf32, #tpu.memory_space<vmem>>, vector<16x128xf32>
    tpu.vector_store %arg4[%c0_29, %c0_30], %95 {strides = array<i32>} : memref<16x128xf32, #tpu.memory_space<vmem>>, vector<16x128xf32>,
    return
  }
}

</mosaic_0001>

<bundles_post_ra>
// kernel: tpu_custom_call.1
= control target key start
LH: loop header
LB: loop body
LE: loop exit
PB: predicated region body
PF: predicated region fallthrough
CT: control target
= control target key end

     0   :  { %9 = vsyncpa [#allocation3], 0  ;;  %s1167_s0 = inlined_call_operand.hbm [shape: bf16[16,32], index: 0, kind: input, shape index: {}]   ;;  %s1168_s1 = inlined_call_operand.hbm [shape: f32[16,16], index: 1, kind: input, shape index: {}]   ;;  %s1169_s2 = inlined_call_operand.hbm [shape: bf16[2,32,128], index: 2, kind: input, shape index: {}]   ;;  %s1170_s3 = inlined_call_operand.vmem [shape: f32[2,128], index: 3, kind: input, shape index: {}]   ;;  %s1171_s4 = inlined_call_operand.hbm [shape: f32[16,128], index: 4, kind: output, shape index: {}]  }
   0x1   :  { %10 = vsyncpa [#allocation6], 0 }
   0x2   :  { %11 = vsyncpa [#allocation4], 0  ;;  %s1002_s15 = smov [#allocation5]  }
   0x3   :  { %s29_s16 = sshll.u32 %s1002_s15, 4  ;;  %s30_s16 = int_to_ptr.vmem [resolvable:$true] %s29_s16 }
   0x4   :  { %s924_s17 = scalar_lea.vmem %s30_s16, 256  ;;  %p929_p1 = scmp.lt.s32.totalorder %s30_s16, %s30_s16 }
   0x5   :  { %p925_p0 = scmp.ne.s32.totalorder %s30_s16, %s924_s17  ;;  %p930_p2 = scmp.lt.s32.totalorder %s924_s17, %s924_s17 }
   0x7   :  { %p931_p3 = por %p930_p2, %p929_p1 }
   0x9   :  { %p932_p4 = pnand %p931_p3, %p925_p0 }
   0xb   :  { %935 = shalt.err (!%p932_p4)
}
   0xc   :  { %s1003_s18 = smov 128   ;;  %s1004_s19 = smov 8  }
   0xd   :  { %35 = dma.hbm_to_vmem [thread:$0]  %s1168_s1, 256, %s30_s16, [#allocation6], %s1003_s18, %s1003_s18, %s1004_s19  }
   0xe   :  { %s1005_s22 = smov [#allocation2]  }
   0xf   :  { %s17_s23 = sshll.u32 %s1005_s22, 4  ;;  %s18_s23 = int_to_ptr.vmem [resolvable:$true] %s17_s23 }
  0x10   :  { %s944_s24 = scalar_lea.vmem %s18_s23, 128  ;;  %p949_p6 = scmp.lt.s32.totalorder %s18_s23, %s18_s23 }
  0x11   :  { %p945_p5 = scmp.ne.s32.totalorder %s18_s23, %s944_s24  ;;  %p950_p7 = scmp.lt.s32.totalorder %s944_s24, %s944_s24 }
  0x13   :  { %p951_p8 = por %p950_p7, %p949_p6 }
  0x15   :  { %p952_p9 = pnand %p951_p8, %p945_p5 }
  0x17   :  { %955 = shalt.err (!%p952_p9)
}
  0x18   :  { %s1006_s25 = smov 64   ;;  %s1007_s26 = smov 4  }
  0x19   :  { %23 = dma.hbm_to_vmem [thread:$0]  %s1167_s0, 128, %s18_s23, [#allocation3], %s1006_s25, %s1006_s25, %s1007_s26  }
  0x1a   :  { %s1008_s29 = smov [#allocation7]  }
  0x1b   :  { %s41_s1 = sshll.u32 %s1008_s29, 4  ;;  %s42_s1 = int_to_ptr.vmem [resolvable:$true] %s41_s1 }
  0x1c   :  { %s964_s30 = scalar_lea.vmem %s42_s1, 512  ;;  %p969_p11 = scmp.lt.s32.totalorder %s42_s1, %s42_s1 }
  0x1d   :  { %p965_p10 = scmp.ne.s32.totalorder %s42_s1, %s964_s30  ;;  %p970_p12 = scmp.lt.s32.totalorder %s964_s30, %s964_s30 }
  0x1f   :  { %p971_p13 = por %p970_p12, %p969_p11 }
  0x21   :  { %p972_p0 = pnand %p971_p13, %p965_p10 }
  0x23   :  { %975 = shalt.err (!%p972_p0)
}
  0x24   :  { %47 = dma.hbm_to_vmem [thread:$0]  %s1169_s2, 512, %s42_s1, [#allocation6], %s1006_s25, %s1006_s25, %s1007_s26  }
  0x25   :  { %996 = dma.done.wait [#allocation3], 128  }
  0x26   :  { %997 = vsyncadd [#allocation3], 4294967168 }
  0x27   :  { %998 = dma.done.wait [#allocation6], 768  }
  0x28   :  { %999 = vsyncadd [#allocation6], 4294966528  ;;  %v1009_v0 = vmov 0.0   ;;  %vm1010_vm0 = vmmov 0   ;;  %v879_v1 = vld [vmem:[#allocation7 + $0x8] sm:$0xff]   ;;  %v880_v2 = vld [vmem:[#allocation7] sm:$0xff]  }
  0x29   :  { %778 = vmatprep.subr.bf16.mxu0 %v1009_v0  ;;  %782 = vmatprep.mubr.msk.bf16.mxu0 %vm1010_vm0, %v1009_v0  ;;  %v881_v3 = vld [vmem:[#allocation2] sm:$0xff]   ;;  %vm96_vm1 = vcmask 261120   ;;  %s1011_s7 = smov 120   ;;  %s1012_s8 = smov 96   ;;  %vm145_vm2 = vcmask 64512   ;;  %v73_v23 = vld [vmem:[#allocation5] sm:$0xff] }
  0x2a   :  { %786 = vmatprep.subr.bf16.mxu1 %v1009_v0  ;;  %788 = vmatprep.mubr.msk.bf16.mxu1 %vm1010_vm0, %v1009_v0  ;;  %v739_v5 = vld [vmem:[%s1170_s3] ss:$0 sm:$0xff]  ;;  %s1013_s9 = smov 80   ;;  %s1014_s10 = smov 88   ;;  %vm193_vm3 = vcmask 130048   ;;  %v74_v27 = vld [vmem:[#allocation5 + $0x8] sm:$0xff] }
  0x2b   :  { %779 = vmatpush3.bf16.msra.mxu0 %v879_v1  ;;  %s1015_s11 = smov 72   ;;  %s1016_s12 = smov 112   ;;  %vm655_vm4 = vcmask 195584  }
  0x2c   :  { %780 = vmatprep.subr.bf16.mxu0 %v1009_v0  ;;  %s1017_s13 = smov 104   ;;  %s1018_s14 = smov 56  }
  0x2d   :  { %s1019_s15 = smov 48   ;;  %s1020_s16 = smov 40  }
  0x2e   :  { %s1021_s17 = smov 16   ;;  %s1022_s20 = smov 24  }
  0x2f   :  { %781 = vmatpush3.bf16.msra.mxu0 %v880_v2  ;;  %s1023_s23 = smov [#allocation8]  }
  0x30   :  { %792 = vmatprep.subr.bf16.mxu0 %v1009_v0  ;;  %s726_s24 = sshll.u32 %s1023_s23, 4  ;;  %s727_s24 = int_to_ptr.vmem [resolvable:$true] %s726_s24 }
  0x31   :  { %p981_p2 = scmp.lt.s32.totalorder %s727_s24, %s727_s24 }
  0x32   :  { %783 = vmatmul.mubr.msk.bf16.vlgmr.msra.gmra.mxu0 %vm96_vm1, %v881_v3 }
  0x33   :  { %794 = vmatprep.mubr.msk.bf16.mxu0 %vm1010_vm0, %v1009_v0 }
  0xf2   :  { %v134_v4 = vpop.f32.mrf.mxu0 }
  0xf3   :  { %v135_v8 = vadd.f32 %v739_v5, %v134_v4 }
  0xf4   :  { %v784_v6 = vpop.f32.mrf.mxu0 }
  0xf6   :  { %v137_v7 = vpop.f32.mrf.mxu0 }
  0xf7   :  { %v138_v9 = vadd.f32 %v739_v5, %v137_v7 }
  0xf8   :  { %v785_v10 = vpop.f32.mrf.mxu0 }
  0xf9   :  { %v1079_v11 = vpack.c.bf16 %v138_v9, %v135_v8 }
  0xfb   :  { %264 = vrot.lane.b32.xlu1 %v1079_v11, %s1011_s7  ;;  %143 = vrot.lane.b32.xlu0 %v1079_v11, %s1012_s8 }
  0xff   :  { %387 = vrot.lane.b32.xlu1 %v1079_v11, %s1013_s9  ;;  %266 = vrot.lane.b32.xlu0 %v1079_v11, %s1014_s10 }
 0x103   :  { %508 = vrot.lane.b32.xlu1 %v1079_v11, %s1015_s11  ;;  %385 = vrot.lane.b32.xlu0 %v1079_v11, %s1016_s12 }
 0x107   :  { %506 = vrot.lane.b32.xlu0 %v1079_v11, %s1017_s13 }
 0x16d   :  { %v144_v12 = vpop.permute.xlu0 %143  ;;  %v265_v15 = vpop.permute.xlu1 %264 }
 0x16e   :  { %v150_v13 = vsel %vm145_vm2, %v144_v12, 0 }
 0x16f   :  { %787 = vmatpush3.bf16.xpose.msra.mxu1 %v150_v13 }
 0x170   :  { %798 = vmatprep.subr.bf16.mxu1 %v1009_v0 }
 0x171   :  { %v267_v14 = vpop.permute.xlu0 %266  ;;  %v388_v17 = vpop.permute.xlu1 %387 }
 0x172   :  { %v272_v16 = vsel %vm145_vm2, %v267_v14, 0  ;;  %v393_v18 = vsel %vm145_vm2, %v388_v17, 0 }
 0x175   :  { %v509_v19 = vpop.permute.xlu1 %508  ;;  %v386_v20 = vpop.permute.xlu0 %385 }
 0x176   :  { %789 = vmatmul.mubr.msk.bf16.vlgmr.msra.gmra.mxu1 %vm145_vm2, %v1079_v11  ;;  %v514_v21 = vsel %vm145_vm2, %v509_v19, 0 }
 0x177   :  { %799 = vmatpush3.bf16.xpose.msra.mxu1 %v272_v16  ;;  %800 = vmatprep.mubr.msk.bf16.mxu1 %vm1010_vm0, %v1009_v0 }
 0x178   :  { %810 = vmatprep.subr.bf16.mxu1 %v1009_v0 }
 0x179   :  { %v507_v22 = vpop.permute.xlu0 %506 }
 0x17e   :  { %801 = vmatmul.mubr.msk.bf16.vlgmr.msra.gmra.mxu1 %vm145_vm2, %v265_v15 }
 0x17f   :  { %811 = vmatpush3.bf16.xpose.msra.mxu1 %v393_v18  ;;  %812 = vmatprep.mubr.msk.bf16.mxu1 %vm1010_vm0, %v1009_v0 }
 0x180   :  { %822 = vmatprep.subr.bf16.mxu1 %v1009_v0 }
 0x186   :  { %813 = vmatmul.mubr.msk.bf16.vlgmr.msra.gmra.mxu1 %vm145_vm2, %v386_v20 }
 0x187   :  { %823 = vmatpush3.bf16.xpose.msra.mxu1 %v514_v21  ;;  %824 = vmatprep.mubr.msk.bf16.mxu1 %vm1010_vm0, %v1009_v0 }
 0x188   :  { %834 = vmatprep.subr.bf16.mxu1 %v1009_v0 }
 0x18e   :  { %825 = vmatmul.mubr.msk.bf16.vlgmr.msra.gmra.mxu1 %vm145_vm2, %v507_v22 }
 0x18f   :  { %838 = vmatprep.mubr.msk.bf16.mxu1 %vm1010_vm0, %v1009_v0 }
 0x236   :  { %v186_v24 = vpop.f32.mrf.mxu1 }
 0x237   :  { %v187_v25 = vadd.f32 %v186_v24, %v73_v23 }
 0x238   :  { %v790_v26 = vpop.f32.mrf.mxu1 }
 0x239   :  { %v194_v28 = vsel %vm193_vm3, %v187_v25, -inf }
 0x23a   :  { %195 = vmax.xlane.f32.xlu1 %v194_v28  ;;  %v189_v29 = vpop.f32.mrf.mxu1 }
 0x23b   :  { %v190_v30 = vadd.f32 %v189_v29, %v74_v27 }
 0x23c   :  { %v791_v31 = vpop.f32.mrf.mxu1 }
 0x23d   :  { %v197_v32 = vsel %vm193_vm3, %v190_v30, -inf }
 0x23e   :  { %198 = vmax.xlane.f32.xlu0 %v197_v32  ;;  %v308_v33 = vpop.f32.mrf.mxu1 }
 0x23f   :  { %v309_v34 = vadd.f32 %v308_v33, %v73_v23 }
 0x240   :  { %v802_v35 = vpop.f32.mrf.mxu1 }
 0x241   :  { %v315_v36 = vsel %vm193_vm3, %v309_v34, -inf }
 0x242   :  { %316 = vmax.xlane.f32.xlu0 %v315_v36  ;;  %v311_v37 = vpop.f32.mrf.mxu1 }
 0x243   :  { %v312_v38 = vadd.f32 %v311_v37, %v74_v27 }
 0x244   :  { %v803_v39 = vpop.f32.mrf.mxu1 }
 0x245   :  { %v318_v40 = vsel %vm193_vm3, %v312_v38, -inf }
 0x246   :  { %319 = vmax.xlane.f32.xlu1 %v318_v40  ;;  %v429_v41 = vpop.f32.mrf.mxu1 }
 0x247   :  { %v430_v42 = vadd.f32 %v429_v41, %v73_v23 }
 0x248   :  { %v814_v43 = vpop.f32.mrf.mxu1 }
 0x249   :  { %v436_v44 = vsel %vm193_vm3, %v430_v42, -inf }
 0x24a   :  { %437 = vmax.xlane.f32.xlu0 %v436_v44  ;;  %v432_v45 = vpop.f32.mrf.mxu1 }
 0x24b   :  { %v433_v46 = vadd.f32 %v432_v45, %v74_v27 }
 0x24c   :  { %v815_v47 = vpop.f32.mrf.mxu1 }
 0x24d   :  { %v439_v48 = vsel %vm193_vm3, %v433_v46, -inf }
 0x24e   :  { %440 = vmax.xlane.f32.xlu1 %v439_v48  ;;  %v550_v49 = vpop.f32.mrf.mxu1 }
 0x24f   :  { %v551_v50 = vadd.f32 %v550_v49, %v73_v23 }
 0x250   :  { %v826_v51 = vpop.f32.mrf.mxu1 }
 0x251   :  { %v557_v52 = vsel %vm193_vm3, %v551_v50, -inf }
 0x252   :  { %558 = vmax.xlane.f32.xlu0 %v557_v52  ;;  %v553_v53 = vpop.f32.mrf.mxu1 }
 0x253   :  { %v554_v54 = vadd.f32 %v553_v53, %v74_v27 }
 0x254   :  { %v827_v55 = vpop.f32.mrf.mxu1 }
 0x255   :  { %v560_v56 = vsel %vm193_vm3, %v554_v54, -inf }
 0x256   :  { %561 = vmax.xlane.f32.xlu1 %v560_v56 }
 0x2c3   :  { %v196_v57 = vpop.xlane.xlu1 %195 }
 0x2c4   :  { %v200_v58 = vsub.f32 %v187_v25, %v196_v57 }
 0x2c6   :  { %v202_v59 = vmul.f32 1.442695, %v200_v58 }
 0x2c7   :  { %v199_v60 = vpop.xlane.xlu0 %198 }
 0x2c8   :  { %884 = vpow2.f32 %v202_v59  ;;  %v201_v61 = vsub.f32 %v190_v30, %v199_v60 }
 0x2ca   :  { %v204_v62 = vmul.f32 1.442695, %v201_v61 }
 0x2cb   :  { %v317_v63 = vpop.xlane.xlu0 %316 }
 0x2cc   :  { %886 = vpow2.f32 %v204_v62  ;;  %v321_v1 = vsub.f32 %v309_v34, %v317_v63 }
 0x2ce   :  { %v323_v2 = vmul.f32 1.442695, %v321_v1 }
 0x2cf   :  { %v320_v9 = vpop.xlane.xlu1 %319 }
 0x2d0   :  { %888 = vpow2.f32 %v323_v2  ;;  %v322_v10 = vsub.f32 %v312_v38, %v320_v9 }
 0x2d2   :  { %v325_v15 = vmul.f32 1.442695, %v322_v10  ;;  %v882_v10 = vld [vmem:[#allocation7 + $0x18] sm:$0xff]  }
 0x2d3   :  { %v438_v12 = vpop.xlane.xlu0 %437  ;;  %835 = vmatpush3.bf16.msra.mxu1 %v882_v10 }
 0x2d4   :  { %v442_v14 = vsub.f32 %v430_v42, %v438_v12  ;;  %890 = vpow2.f32 %v325_v15  ;;  %836 = vmatprep.subr.bf16.mxu1 %v1009_v0 }
 0x2d5   :  { %v885_v3 = vpop.eup %884 }
 0x2d6   :  { %v206_v4 = vsel %vm193_vm3, %v885_v3, 0.0  ;;  %v444_v19 = vmul.f32 1.442695, %v442_v14 }
 0x2d7   :  { %207 = vadd.xlane.f32.xlu0 %v206_v4  ;;  %v441_v13 = vpop.xlane.xlu1 %440 }
 0x2d8   :  { %v443_v16 = vsub.f32 %v433_v46, %v441_v13  ;;  %892 = vpow2.f32 %v444_v19 }
 0x2d9   :  { %v887_v5 = vpop.eup %886 }
 0x2da   :  { %v209_v6 = vsel %vm193_vm3, %v887_v5, 0.0  ;;  %v446_v21 = vmul.f32 1.442695, %v443_v16  ;;  %v883_v16 = vld [vmem:[#allocation7 + $0x10] sm:$0xff]  }
 0x2db   :  { %210 = vadd.xlane.f32.xlu1 %v209_v6  ;;  %v559_v17 = vpop.xlane.xlu0 %558  ;;  %837 = vmatpush3.bf16.msra.mxu1 %v883_v16 }
 0x2dc   :  { %v563_v20 = vsub.f32 %v551_v50, %v559_v17  ;;  %894 = vpow2.f32 %v446_v21 }
 0x2dd   :  { %v1119_v7 = vpop.eup %888 }
 0x2de   :  { %v327_v8 = vsel %vm193_vm3, %v1119_v7, 0.0  ;;  %v565_v23 = vmul.f32 1.442695, %v563_v20 }
 0x2df   :  { %328 = vadd.xlane.f32.xlu0 %v327_v8  ;;  %v562_v18 = vpop.xlane.xlu1 %561 }
 0x2e0   :  { %v564_v22 = vsub.f32 %v554_v54, %v562_v18  ;;  %896 = vpow2.f32 %v565_v23 }
 0x2e1   :  { %v891_v25 = vpop.eup %890 }
 0x2e2   :  { %v567_v24 = vmul.f32 1.442695, %v564_v22  ;;  %v330_v27 = vsel %vm193_vm3, %v891_v25, 0.0 }
 0x2e4   :  { %898 = vpow2.f32 %v567_v24 }
 0x2e5   :  { %v893_v26 = vpop.eup %892 }
 0x2e6   :  { %v448_v31 = vsel %vm193_vm3, %v893_v26, 0.0 }
 0x2e9   :  { %v895_v28 = vpop.eup %894 }
 0x2ea   :  { %v451_v30 = vsel %vm193_vm3, %v895_v28, 0.0 }
 0x2ec   :  { %338 = vrot.lane.b32.xlu1 %v1079_v11, %s1018_s14 }
 0x2ed   :  { %v1127_v29 = vpop.eup %896 }
 0x2ee   :  { %v569_v34 = vsel %vm193_vm3, %v1127_v29, 0.0 }
 0x2f1   :  { %v899_v32 = vpop.eup %898 }
 0x2f2   :  { %v572_v33 = vsel %vm193_vm3, %v899_v32, 0.0 }
 0x2f5   :  { %217 = vrot.lane.b32.xlu0 %v1079_v11, %s1006_s25  ;;  %s976_s25 = scalar_lea.vmem %s727_s24, 256 }
 0x2f6   :  { %p977_p1 = scmp.ne.s32.totalorder %s727_s24, %s976_s25  ;;  %p982_p3 = scmp.lt.s32.totalorder %s976_s25, %s976_s25 }
 0x2f8   :  { %p983_p4 = por %p982_p3, %p981_p2 }
 0x2fa   :  { %p984_p5 = pnand %p983_p4, %p977_p1 }
 0x310   :  { %331 = vadd.xlane.f32.xlu1 %v330_v27 }
 0x314   :  { %452 = vadd.xlane.f32.xlu1 %v451_v30  ;;  %449 = vadd.xlane.f32.xlu0 %v448_v31 }
 0x318   :  { %573 = vadd.xlane.f32.xlu1 %v572_v33  ;;  %570 = vadd.xlane.f32.xlu0 %v569_v34 }
 0x329   :  { %459 = vrot.lane.b32.xlu1 %v1079_v11, %s1019_s15 }
 0x32e   :  { %580 = vrot.lane.b32.xlu0 %v1079_v11, %s1020_s16 }
 0x360   :  { %v208_v35 = vpop.xlane.xlu0 %207 }
 0x361   :  { %900 = vrcp.f32 %v208_v35 }
 0x364   :  { %v211_v36 = vpop.xlane.xlu1 %210 }
 0x365   :  { %902 = vrcp.f32 %v211_v36 }
 0x368   :  { %v329_v37 = vpop.xlane.xlu0 %328  ;;  %v339_v44 = vpop.permute.xlu1 %338 }
 0x369   :  { %904 = vrcp.f32 %v329_v37 }
 0x36c   :  { %v218_v38 = vpop.permute.xlu0 %217 }
 0x36d   :  { %793 = vmatpush3.bf16.msra.mxu0 %v218_v38 }
 0x36e   :  { %804 = vmatprep.subr.bf16.mxu0 %v1009_v0  ;;  %v901_v39 = vpop.eup %900 }
 0x36f   :  { %v214_v41 = vmul.f32 %v901_v39, %v885_v3 }
 0x372   :  { %v903_v40 = vpop.eup %902 }
 0x373   :  { %v215_v42 = vmul.f32 %v903_v40, %v887_v5  ;;  %v752_v40 = vld [vmem:[%s1170_s3 + $0x1] ss:$0 sm:$0xff] }
 0x375   :  { %v216_v43 = vpack.c.bf16 %v215_v42, %v214_v41 }
 0x376   :  { %v905_v49 = vpop.eup %904 }
 0x377   :  { %795 = vmatmul.mubr.msk.bf16.vlgmr.msra.gmra.mxu0 %vm193_vm3, %v216_v43  ;;  %v335_v51 = vmul.f32 %v905_v49, %v1119_v7 }
 0x378   :  { %805 = vmatpush3.bf16.msra.mxu0 %v339_v44  ;;  %806 = vmatprep.mubr.msk.bf16.mxu0 %vm1010_vm0, %v1009_v0 }
 0x379   :  { %816 = vmatprep.subr.bf16.mxu0 %v1009_v0 }
 0x399   :  { %v332_v11 = vpop.xlane.xlu1 %331 }
 0x39a   :  { %906 = vrcp.f32 %v332_v11 }
 0x39d   :  { %v453_v45 = vpop.xlane.xlu1 %452  ;;  %v450_v46 = vpop.xlane.xlu0 %449 }
 0x39e   :  { %908 = vrcp.f32 %v453_v45 }
 0x39f   :  { %910 = vrcp.f32 %v450_v46 }
 0x3a1   :  { %v574_v47 = vpop.xlane.xlu1 %573  ;;  %v571_v48 = vpop.xlane.xlu0 %570 }
 0x3a2   :  { %912 = vrcp.f32 %v574_v47 }
 0x3a3   :  { %914 = vrcp.f32 %v571_v48 }
 0x3a5   :  { %v460_v56 = vpop.permute.xlu1 %459  ;;  %v581_v62 = vpop.permute.xlu0 %580 }
 0x3a7   :  { %v907_v50 = vpop.eup %906 }
 0x3a8   :  { %v336_v52 = vmul.f32 %v907_v50, %v891_v25 }
 0x3aa   :  { %v337_v53 = vpack.c.bf16 %v336_v52, %v335_v51 }
 0x3ab   :  { %v909_v54 = vpop.eup %908 }
 0x3ac   :  { %v911_v55 = vpop.eup %910  ;;  %807 = vmatmul.mubr.msk.bf16.vlgmr.msra.gmra.mxu0 %vm193_vm3, %v337_v53  ;;  %v457_v58 = vmul.f32 %v909_v54, %v895_v28 }
 0x3ad   :  { %817 = vmatpush3.bf16.msra.mxu0 %v460_v56  ;;  %818 = vmatprep.mubr.msk.bf16.mxu0 %vm1010_vm0, %v1009_v0  ;;  %v456_v57 = vmul.f32 %v911_v55, %v893_v26 }
 0x3ae   :  { %828 = vmatprep.subr.bf16.mxu0 %v1009_v0 }
 0x3af   :  { %v913_v59 = vpop.eup %912  ;;  %v458_v60 = vpack.c.bf16 %v457_v58, %v456_v57 }
 0x3b0   :  { %v915_v61 = vpop.eup %914  ;;  %v578_v1 = vmul.f32 %v913_v59, %v899_v32 }
 0x3b1   :  { %v577_v63 = vmul.f32 %v915_v61, %v1127_v29 }
 0x3b3   :  { %v579_v2 = vpack.c.bf16 %v578_v1, %v577_v63 }
 0x3b4   :  { %819 = vmatmul.mubr.msk.bf16.vlgmr.msra.gmra.mxu0 %vm193_vm3, %v458_v60 }
 0x3b5   :  { %829 = vmatpush3.bf16.msra.mxu0 %v581_v62  ;;  %830 = vmatprep.mubr.msk.bf16.mxu0 %vm1010_vm0, %v1009_v0 }
 0x3bc   :  { %831 = vmatmul.mubr.msk.bf16.vlgmr.msra.gmra.mxu0 %vm193_vm3, %v579_v2 }
 0x437   :  { %v257_v3 = vpop.f32.mrf.mxu0 }
 0x439   :  { %v796_v4 = vpop.f32.mrf.mxu0 }
 0x43b   :  { %v260_v5 = vpop.f32.mrf.mxu0 }
 0x43d   :  { %v797_v6 = vpop.f32.mrf.mxu0 }
 0x46c   :  { %v378_v7 = vpop.f32.mrf.mxu0 }
 0x46e   :  { %v808_v8 = vpop.f32.mrf.mxu0 }
 0x470   :  { %v381_v9 = vpop.f32.mrf.mxu0 }
 0x471   :  { %v864_v12 = vpack.i.bf16 %v381_v9, %v378_v7 }
 0x472   :  { %v809_v13 = vpop.f32.mrf.mxu0 }
 0x473   :  { %865 = vrot.lane.b32.xlu1 %v864_v12, %s1004_s19 }
 0x474   :  { %v499_v14 = vpop.f32.mrf.mxu0 }
 0x476   :  { %v820_v15 = vpop.f32.mrf.mxu0 }
 0x478   :  { %v502_v17 = vpop.f32.mrf.mxu0 }
 0x479   :  { %v869_v18 = vpack.i.bf16 %v502_v17, %v499_v14 }
 0x47a   :  { %v821_v19 = vpop.f32.mrf.mxu0 }
 0x47b   :  { %870 = vrot.lane.b32.xlu0 %v869_v18, %s1021_s17 }
 0x47c   :  { %v620_v20 = vpop.f32.mrf.mxu0 }
 0x47e   :  { %v832_v21 = vpop.f32.mrf.mxu0 }
 0x480   :  { %v623_v22 = vpop.f32.mrf.mxu0 }
 0x481   :  { %v874_v23 = vpack.i.bf16 %v623_v22, %v620_v20 }
 0x482   :  { %v833_v24 = vpop.f32.mrf.mxu0 }
 0x483   :  { %875 = vrot.lane.b32.xlu1 %v874_v23, %s1022_s20 }
 0x4e5   :  { %v866_v25 = vpop.permute.xlu1 %865 }
 0x4e6   :  { %v868_v27 = vunpack.i.h.bf16 %v866_v25  ;;  %v867_v0 = vunpack.i.l.bf16 %v866_v25 }
 0x4e8   :  { %v652_v31 = vsel %vm145_vm2, %v260_v5, %v868_v27  ;;  %v651_v32 = vsel %vm145_vm2, %v257_v3, %v867_v0 }
 0x4ed   :  { %v871_v26 = vpop.permute.xlu0 %870 }
 0x4ee   :  { %v873_v28 = vunpack.i.h.bf16 %v871_v26  ;;  %v872_v29 = vunpack.i.l.bf16 %v871_v26 }
 0x4f0   :  { %v654_v35 = vsel %vm193_vm3, %v652_v31, %v873_v28  ;;  %v653_v36 = vsel %vm193_vm3, %v651_v32, %v872_v29 }
 0x4f5   :  { %v876_v30 = vpop.permute.xlu1 %875 }
 0x4f6   :  { %v878_v33 = vunpack.i.h.bf16 %v876_v30  ;;  %v877_v34 = vunpack.i.l.bf16 %v876_v30 }
 0x4f8   :  { %v657_v37 = vsel %vm655_vm4, %v654_v35, %v878_v33  ;;  %v656_v38 = vsel %vm655_vm4, %v653_v36, %v877_v34 }
 0x4f9   :  { %v658_v39 = vpack.c.bf16 %v657_v37, %v656_v38 }
 0x4fb   :  { %839 = vmatmul.mubr.msk.bf16.vlgmr.msra.gmra.mxu1 %vm96_vm1, %v658_v39 }
 0x5bb   :  { %v712_v41 = vpop.f32.mrf.mxu1 }
 0x5bc   :  { %v713_v42 = vadd.f32 %v752_v40, %v712_v41 }
 0x5bd   :  { %v840_v43 = vpop.f32.mrf.mxu1 }
 0x5be   :  { %719 = vst [vmem:[#allocation8] sm:$0xff] %v713_v42 }
 0x5bf   :  { %v715_v44 = vpop.f32.mrf.mxu1 }
 0x5c0   :  { %v716_v11 = vadd.f32 %v752_v40, %v715_v44 }
 0x5c1   :  { %v841_v45 = vpop.f32.mrf.mxu1 }
 0x5c2   :  { %720 = vst [vmem:[#allocation8 + $0x8] sm:$0xff] %v716_v11 }
 0x5c3   :  { %987 = shalt.err (!%p984_p5)
}
 0x5c4   :  { %732 = dma.vmem_to_hbm [thread:$0]  %s727_s24, 256, %s1171_s4, [#allocation4], %s1003_s18, %s1003_s18, %s1004_s19  }
 0x5c5   :  { %1000 = dma.done.wait [#allocation4], 256  }
 0x5c6   :  { %1001 = vsyncadd [#allocation4], 4294967040 }
 0x5c7   :  { %736 = vsyncpa [#allocation3], 1 }
 0x5c8   :  { %737 = vsyncpa [#allocation6], 1 }
 0x5c9   :  { %738 = vsyncpa [#allocation4], 1 }

</bundles_post_ra>
